<compile_context>
chip_gen: v7x
topology: tpu7x:2x2x1
jax: 0.10.0
libtpu: 0.0.40
codegen_flags: <defaults>
</compile_context>

<pallas_src>
import math

import jax
import jax.numpy as jnp
import numpy as np
from jax import lax
from jax.experimental import pallas as pl
from jax.experimental.pallas import tpu as pltpu  # noqa: F401

# ---------------- config (consistent with T5Block.__init__) -----------------
B = 2          # batch
S = 8          # sequence length
D_MODEL = 32   # config.d_model
D_KV = 8       # config.d_kv
N_HEADS = 4    # config.num_heads
INNER = N_HEADS * D_KV          # 32
D_FF = 64      # config.d_ff
NUM_BUCKETS = 32                # config.relative_attention_num_buckets
LN_EPS = 1e-6                   # config.layer_norm_epsilon
IS_DECODER = False

BS = B * S                      # 16  hidden rows
BHS = N_HEADS * B * S           # 64  stacked (head, batch, seq) rows
NEG = -1e9                      # finite mask value (never a full row)

# packed-parameter row offsets (all multiples of 8 -> sublane-aligned slices)
LN1_R = 0
WQKV_R = LN1_R + 8              # 8
WO_R = WQKV_R + D_MODEL         # 40
PB_R = WO_R + INNER             # 72
LN2_R = PB_R + BHS              # 136
WI_R = LN2_R + 8                # 144
WO2_R = WI_R + D_MODEL          # 176
P_ROWS = WO2_R + D_FF           # 240
P_LANES = 128


# ---------------- relative position bias (plain-JAX glue) -------------------
def _relative_position_bucket(relative_position, bidirectional=True,
                              num_buckets=32, max_distance=128):
    ret = jnp.zeros_like(relative_position)
    n = -relative_position
    if bidirectional:
        num_buckets //= 2
        ret = ret + (n < 0).astype(jnp.int32) * num_buckets
        n = jnp.abs(n)
    else:
        n = jnp.maximum(n, 0)
    max_exact = num_buckets // 2
    is_small = n < max_exact
    val_if_large = max_exact + (
        jnp.log(n.astype(jnp.float32) / max_exact)
        / math.log(max_distance / max_exact)
        * (num_buckets - max_exact)
    ).astype(jnp.int32)
    val_if_large = jnp.minimum(val_if_large, num_buckets - 1)
    ret = ret + jnp.where(is_small, n, val_if_large)
    return ret


def compute_position_bias(rel_bias_emb, qlen, klen, is_decoder):
    # rel_bias_emb: [num_buckets, n_heads]
    ctx_pos = jnp.arange(qlen, dtype=jnp.int32)[:, None]
    mem_pos = jnp.arange(klen, dtype=jnp.int32)[None, :]
    rel_pos = mem_pos - ctx_pos
    rp_bucket = _relative_position_bucket(
        rel_pos, bidirectional=not is_decoder, num_buckets=NUM_BUCKETS)
    values = rel_bias_emb[rp_bucket]                 # (qlen, klen, n_heads)
    return jnp.transpose(values, (2, 0, 1))          # (n_heads, qlen, klen)


# ---------------- the fused Pallas kernel -----------------------------------
def t5_block_kernel(x_ref, p_ref, out_ref):
    x = x_ref[...]                                               # (BS, D)

    # static, aligned slices out of the single packed-parameter buffer
    ln1 = p_ref[LN1_R:LN1_R + 1, 0:D_MODEL]                      # (1, D)
    wqkv = p_ref[WQKV_R:WQKV_R + D_MODEL, 0:3 * INNER]           # (D, 3*INNER)
    wo = p_ref[WO_R:WO_R + INNER, 0:D_MODEL]                     # (INNER, D)
    bias = p_ref[PB_R:PB_R + BHS, 0:BHS]                         # (BHS, BHS)
    ln2 = p_ref[LN2_R:LN2_R + 1, 0:D_MODEL]                      # (1, D)
    wi = p_ref[WI_R:WI_R + D_MODEL, 0:D_FF]                      # (D, D_FF)
    wo2 = p_ref[WO2_R:WO2_R + D_FF, 0:D_MODEL]                   # (D_FF, D)

    # ---- T5LayerSelfAttention: T5LayerNorm (rms, no mean subtraction) ----
    nx = x * lax.rsqrt(jnp.mean(x * x, axis=-1, keepdims=True) + LN_EPS) * ln1

    # ---- fused QKV projection; columns ordered (head, {q,k,v}, d_kv) ----
    qkv = jnp.dot(nx, wqkv, preferred_element_type=jnp.float32)  # (BS, 3*INNER)

    # stack heads onto sublanes: rows ordered (head, batch, seq)
    stacked = jnp.concatenate(
        [qkv[:, h * 3 * D_KV:(h + 1) * 3 * D_KV] for h in range(N_HEADS)],
        axis=0)                                                  # (BHS, 3*D_KV)
    q_s = stacked[:, 0:D_KV]                                     # (BHS, D_KV)
    k_s = stacked[:, D_KV:2 * D_KV]
    v_s = stacked[:, 2 * D_KV:3 * D_KV]

    # ---- ONE batched scores matmul; bias = position bias + block-diag mask ----
    scores = lax.dot_general(q_s, k_s, (((1,), (1,)), ((), ())),
                             preferred_element_type=jnp.float32)  # (BHS, BHS)
    scores = scores + bias

    # ---- single dense softmax over the (64, 64) slab ----
    m = jnp.max(scores, axis=-1, keepdims=True)
    p = jnp.exp(scores - m)
    w = p * pl.reciprocal(jnp.sum(p, axis=-1, keepdims=True), approx=True)

    # ---- ONE batched context matmul ----
    ctx = jnp.dot(w, v_s, preferred_element_type=jnp.float32)     # (BHS, D_KV)

    # un-stack heads back to lanes: (BS, INNER) with lanes ordered (head, d_kv)
    ctx_flat = jnp.concatenate(
        [ctx[h * BS:(h + 1) * BS, :] for h in range(N_HEADS)], axis=1)

    attn_out = jnp.dot(ctx_flat, wo, preferred_element_type=jnp.float32)
    h1 = x + attn_out                                            # residual

    # ---- T5LayerFF: rms-norm -> wi -> relu -> wo -> residual ----
    nx2 = h1 * lax.rsqrt(jnp.mean(h1 * h1, axis=-1, keepdims=True) + LN_EPS) * ln2
    ff = jnp.maximum(jnp.dot(nx2, wi, preferred_element_type=jnp.float32), 0.0)
    ff = jnp.dot(ff, wo2, preferred_element_type=jnp.float32)
    out_ref[...] = h1 + ff


# ---------------- wrapper: layout prep + single DMA param pack --------------
def _pad_block(a, rows, lanes=P_LANES):
    r, c = a.shape
    return jnp.pad(a.astype(jnp.float32), ((0, rows - r), (0, lanes - c)))


def pack_params(params):
    ln1, wq, wk, wv, wo, rel_bias_emb, ln2, wi, wo2 = params

    # interleave q/k/v per head so the QKV output is head-sliceable in 24-lane
    # chunks: columns ordered (head, {q,k,v}, d_kv)
    w_h = jnp.stack([wq.reshape(D_MODEL, N_HEADS, D_KV),
                     wk.reshape(D_MODEL, N_HEADS, D_KV),
                     wv.reshape(D_MODEL, N_HEADS, D_KV)], axis=2)
    wqkv = w_h.reshape(D_MODEL, 3 * INNER)                       # (D, 96)

    # block-structured bias for the (head, batch, seq) x (head, batch, seq)
    # score matrix: valid blocks carry the T5 position bias, everything else
    # (cross-head / cross-batch) is masked with a large negative constant.
    pos_bias = compute_position_bias(rel_bias_emb, S, S, IS_DECODER)  # (H,S,S)
    val = jnp.broadcast_to(pos_bias[:, None, :, None, None, :],
                           (N_HEADS, B, S, N_HEADS, B, S))
    hh = jnp.arange(N_HEADS)
    bb = jnp.arange(B)
    same = ((hh[:, None, None, None, None, None] ==
             hh[None, None, None, :, None, None]) &
            (bb[None, :, None, None, None, None] ==
             bb[None, None, None, None, :, None]))
    bias_full = jnp.where(same, val, NEG).reshape(BHS, BHS)      # (64, 64)

    return jnp.concatenate([
        _pad_block(ln1, 8),
        _pad_block(wqkv, D_MODEL),
        _pad_block(wo, INNER),
        _pad_block(bias_full, BHS),
        _pad_block(ln2, 8),
        _pad_block(wi, D_MODEL),
        _pad_block(wo2, D_FF),
    ], axis=0)                                                   # (240, 128)


def t5_block_pallas(hidden, params):
    pblock = pack_params(params)
    x_flat = hidden.reshape(BS, D_MODEL).astype(jnp.float32)

    # single gridless invocation: 2 input DMAs (x + packed params), 1 output
    out_flat = pl.pallas_call(
        t5_block_kernel,
        out_shape=jax.ShapeDtypeStruct((BS, D_MODEL), jnp.float32),
    )(x_flat, pblock)
    return out_flat.reshape(B, S, D_MODEL)


# ---------------- pure-JAX reference (mirrors the PyTorch forward) ----------
def t5_block_ref(hidden, params):
    ln1, wq, wk, wv, wo, rel_bias_emb, ln2, wi, wo2 = params

    def rms_norm(x, w):
        var = jnp.mean(x * x, axis=-1, keepdims=True)
        return w * (x / jnp.sqrt(var + LN_EPS))

    nx = rms_norm(hidden, ln1[0])
    q = (nx @ wq).reshape(B, S, N_HEADS, D_KV).transpose(0, 2, 1, 3)
    k = (nx @ wk).reshape(B, S, N_HEADS, D_KV).transpose(0, 2, 1, 3)
    v = (nx @ wv).reshape(B, S, N_HEADS, D_KV).transpose(0, 2, 1, 3)
    scores = jnp.einsum('bnqd,bnkd->bnqk', q, k)
    pos_bias = compute_position_bias(rel_bias_emb, S, S, IS_DECODER)[None]
    scores = scores + pos_bias
    weights = jax.nn.softmax(scores, axis=-1)
    ctx = jnp.einsum('bnqk,bnkd->bnqd', weights, v)
    ctx = ctx.transpose(0, 2, 1, 3).reshape(B, S, INNER)
    h1 = hidden + ctx @ wo
    nx2 = rms_norm(h1, ln2[0])
    ff = jnp.maximum(nx2 @ wi, 0.0) @ wo2
    return h1 + ff


# ---------------- main -------------------------------------------------------
if __name__ == "__main__":
    key = jax.random.PRNGKey(0)
    keys = jax.random.split(key, 10)
    scale = 0.05
    hidden = jax.random.normal(keys[0], (B, S, D_MODEL), jnp.float32)
    ln1 = jnp.ones((1, D_MODEL), jnp.float32)
    wq = scale * jax.random.normal(keys[1], (D_MODEL, INNER), jnp.float32)
    wk = scale * jax.random.normal(keys[2], (D_MODEL, INNER), jnp.float32)
    wv = scale * jax.random.normal(keys[3], (D_MODEL, INNER), jnp.float32)
    wo = scale * jax.random.normal(keys[4], (INNER, D_MODEL), jnp.float32)
    rel_bias_emb = scale * jax.random.normal(keys[5], (NUM_BUCKETS, N_HEADS),
                                             jnp.float32)
    ln2 = jnp.ones((1, D_MODEL), jnp.float32)
    wi = scale * jax.random.normal(keys[6], (D_MODEL, D_FF), jnp.float32)
    wo2 = scale * jax.random.normal(keys[7], (D_FF, D_MODEL), jnp.float32)

    params = (ln1, wq, wk, wv, wo, rel_bias_emb, ln2, wi, wo2)

    out = t5_block_pallas(hidden, params)
    out = jax.block_until_ready(out)

    ref = jax.block_until_ready(t5_block_ref(hidden, params))
    np.testing.assert_allclose(np.asarray(out), np.asarray(ref),
                               rtol=1e-2, atol=1e-2)

    print("KERNEL_OK")
</pallas_src>

<mosaic_0001>
module attributes {stable_mosaic.version = 11 : i64} {
  func.func @t5_block_kernel(%arg0: memref<16x32xf32, #tpu.memory_space<vmem>>, %arg1: memref<240x128xf32, #tpu.memory_space<vmem>>, %arg2: memref<16x32xf32, #tpu.memory_space<vmem>>) attributes {dimension_semantics = [], scalar_prefetch = 0 : i64, scratch_operands = 0 : i64, tpu.core_type = #tpu.core_type<tc>} {
    %c0 = arith.constant 0 : index
    %c0_0 = arith.constant 0 : index
    %0 = vector.load %arg0[%c0, %c0_0] : memref<16x32xf32, #tpu.memory_space<vmem>>, vector<16x32xf32>
    %c0_1 = arith.constant 0 : index
    %c0_2 = arith.constant 0 : index
    %1 = vector.load %arg1[%c0_1, %c0_2] : memref<240x128xf32, #tpu.memory_space<vmem>>, vector<1x32xf32>
    %c8 = arith.constant 8 : index
    %c0_3 = arith.constant 0 : index
    %2 = vector.load %arg1[%c8, %c0_3] : memref<240x128xf32, #tpu.memory_space<vmem>>, vector<32x96xf32>
    %c40 = arith.constant 40 : index
    %c0_4 = arith.constant 0 : index
    %3 = vector.load %arg1[%c40, %c0_4] : memref<240x128xf32, #tpu.memory_space<vmem>>, vector<32x32xf32>
    %c72 = arith.constant 72 : index
    %c0_5 = arith.constant 0 : index
    %4 = vector.load %arg1[%c72, %c0_5] : memref<240x128xf32, #tpu.memory_space<vmem>>, vector<64x64xf32>
    %c136 = arith.constant 136 : index
    %c0_6 = arith.constant 0 : index
    %5 = vector.load %arg1[%c136, %c0_6] : memref<240x128xf32, #tpu.memory_space<vmem>>, vector<1x32xf32>
    %c144 = arith.constant 144 : index
    %c0_7 = arith.constant 0 : index
    %6 = vector.load %arg1[%c144, %c0_7] : memref<240x128xf32, #tpu.memory_space<vmem>>, vector<32x64xf32>
    %c176 = arith.constant 176 : index
    %c0_8 = arith.constant 0 : index
    %7 = vector.load %arg1[%c176, %c0_8] : memref<240x128xf32, #tpu.memory_space<vmem>>, vector<64x32xf32>
    %8 = arith.mulf %0, %0 : vector<16x32xf32>
    %cst = arith.constant dense<0.000000e+00> : vector<16xf32>
    %9 = vector.multi_reduction <add>, %8, %cst [1] : vector<16x32xf32> to vector<16xf32>
    %10 = vector.shape_cast %9 : vector<16xf32> to vector<16x1xf32>
    %cst_9 = arith.constant 3.200000e+01 : f32
    %11 = vector.broadcast %cst_9 : f32 to vector<16x1xf32>
    %12 = arith.divf %10, %11 : vector<16x1xf32>
    %cst_10 = arith.constant 9.99999997E-7 : f32
    %13 = vector.broadcast %cst_10 : f32 to vector<16x1xf32>
    %14 = arith.addf %12, %13 : vector<16x1xf32>
    %15 = math.rsqrt %14 : vector<16x1xf32>
    %16 = vector.broadcast %15 : vector<16x1xf32> to vector<16x32xf32>
    %17 = arith.mulf %0, %16 : vector<16x32xf32>
    %18 = vector.broadcast %1 : vector<1x32xf32> to vector<16x32xf32>
    %19 = arith.mulf %17, %18 : vector<16x32xf32>
    %cst_11 = arith.constant dense<0.000000e+00> : vector<16x96xf32>
    %20 = tpu.matmul %19, %2, %cst_11 {dimension_numbers = #tpu.dot_dimension_numbers<[1], [0], [0], [1], [0, 0, 1, 1], [], []>} : vector<16x32xf32>, vector<32x96xf32>, vector<16x96xf32> -> vector<16x96xf32>
    %21 = vector.extract_strided_slice %20 {offsets = [0, 0], sizes = [16, 24], strides = [1, 1]} : vector<16x96xf32> to vector<16x24xf32>
    %22 = vector.extract_strided_slice %20 {offsets = [0, 24], sizes = [16, 24], strides = [1, 1]} : vector<16x96xf32> to vector<16x24xf32>
    %23 = vector.extract_strided_slice %20 {offsets = [0, 48], sizes = [16, 24], strides = [1, 1]} : vector<16x96xf32> to vector<16x24xf32>
    %24 = vector.extract_strided_slice %20 {offsets = [0, 72], sizes = [16, 24], strides = [1, 1]} : vector<16x96xf32> to vector<16x24xf32>
    %25 = tpu.concatenate %21, %22, %23, %24 in 0 : vector<16x24xf32>, vector<16x24xf32>, vector<16x24xf32>, vector<16x24xf32> -> vector<64x24xf32>
    %26 = vector.extract_strided_slice %25 {offsets = [0, 0], sizes = [64, 8], strides = [1, 1]} : vector<64x24xf32> to vector<64x8xf32>
    %27 = vector.extract_strided_slice %25 {offsets = [0, 8], sizes = [64, 8], strides = [1, 1]} : vector<64x24xf32> to vector<64x8xf32>
    %28 = vector.extract_strided_slice %25 {offsets = [0, 16], sizes = [64, 8], strides = [1, 1]} : vector<64x24xf32> to vector<64x8xf32>
    %cst_12 = arith.constant dense<0.000000e+00> : vector<64x64xf32>
    %29 = tpu.matmul %26, %27, %cst_12 {dimension_numbers = #tpu.dot_dimension_numbers<[1], [1], [0], [0], [0, 0, 1, 0], [], []>} : vector<64x8xf32>, vector<64x8xf32>, vector<64x64xf32> -> vector<64x64xf32>
    %30 = arith.addf %29, %4 : vector<64x64xf32>
    %cst_13 = arith.constant dense<0xFF800000> : vector<64xf32>
    %31 = vector.multi_reduction <maximumf>, %30, %cst_13 [1] : vector<64x64xf32> to vector<64xf32>
    %32 = vector.shape_cast %31 : vector<64xf32> to vector<64x1xf32>
    %33 = vector.broadcast %32 : vector<64x1xf32> to vector<64x64xf32>
    %34 = arith.subf %30, %33 : vector<64x64xf32>
    %35 = math.exp %34 : vector<64x64xf32>
    %cst_14 = arith.constant dense<0.000000e+00> : vector<64xf32>
    %36 = vector.multi_reduction <add>, %35, %cst_14 [1] : vector<64x64xf32> to vector<64xf32>
    %37 = vector.shape_cast %36 : vector<64xf32> to vector<64x1xf32>
    %38 = tpu.reciprocal %37 {approx = true} : vector<64x1xf32> -> vector<64x1xf32>
    %39 = vector.broadcast %38 : vector<64x1xf32> to vector<64x64xf32>
    %40 = arith.mulf %35, %39 : vector<64x64xf32>
    %cst_15 = arith.constant dense<0.000000e+00> : vector<64x8xf32>
    %41 = tpu.matmul %40, %28, %cst_15 {dimension_numbers = #tpu.dot_dimension_numbers<[1], [0], [0], [1], [0, 0, 1, 1], [], []>} : vector<64x64xf32>, vector<64x8xf32>, vector<64x8xf32> -> vector<64x8xf32>
    %42 = vector.extract_strided_slice %41 {offsets = [0, 0], sizes = [16, 8], strides = [1, 1]} : vector<64x8xf32> to vector<16x8xf32>
    %43 = vector.extract_strided_slice %41 {offsets = [16, 0], sizes = [16, 8], strides = [1, 1]} : vector<64x8xf32> to vector<16x8xf32>
    %44 = vector.extract_strided_slice %41 {offsets = [32, 0], sizes = [16, 8], strides = [1, 1]} : vector<64x8xf32> to vector<16x8xf32>
    %45 = vector.extract_strided_slice %41 {offsets = [48, 0], sizes = [16, 8], strides = [1, 1]} : vector<64x8xf32> to vector<16x8xf32>
    %46 = tpu.concatenate %42, %43, %44, %45 in 1 : vector<16x8xf32>, vector<16x8xf32>, vector<16x8xf32>, vector<16x8xf32> -> vector<16x32xf32>
    %cst_16 = arith.constant dense<0.000000e+00> : vector<16x32xf32>
    %47 = tpu.matmul %46, %3, %cst_16 {dimension_numbers = #tpu.dot_dimension_numbers<[1], [0], [0], [1], [0, 0, 1, 1], [], []>} : vector<16x32xf32>, vector<32x32xf32>, vector<16x32xf32> -> vector<16x32xf32>
    %48 = arith.addf %0, %47 : vector<16x32xf32>
    %49 = arith.mulf %48, %48 : vector<16x32xf32>
    %cst_17 = arith.constant dense<0.000000e+00> : vector<16xf32>
    %50 = vector.multi_reduction <add>, %49, %cst_17 [1] : vector<16x32xf32> to vector<16xf32>
    %51 = vector.shape_cast %50 : vector<16xf32> to vector<16x1xf32>
    %cst_18 = arith.constant 3.200000e+01 : f32
    %52 = vector.broadcast %cst_18 : f32 to vector<16x1xf32>
    %53 = arith.divf %51, %52 : vector<16x1xf32>
    %cst_19 = arith.constant 9.99999997E-7 : f32
    %54 = vector.broadcast %cst_19 : f32 to vector<16x1xf32>
    %55 = arith.addf %53, %54 : vector<16x1xf32>
    %56 = math.rsqrt %55 : vector<16x1xf32>
    %57 = vector.broadcast %56 : vector<16x1xf32> to vector<16x32xf32>
    %58 = arith.mulf %48, %57 : vector<16x32xf32>
    %59 = vector.broadcast %5 : vector<1x32xf32> to vector<16x32xf32>
    %60 = arith.mulf %58, %59 : vector<16x32xf32>
    %cst_20 = arith.constant dense<0.000000e+00> : vector<16x64xf32>
    %61 = tpu.matmul %60, %6, %cst_20 {dimension_numbers = #tpu.dot_dimension_numbers<[1], [0], [0], [1], [0, 0, 1, 1], [], []>} : vector<16x32xf32>, vector<32x64xf32>, vector<16x64xf32> -> vector<16x64xf32>
    %cst_21 = arith.constant 0.000000e+00 : f32
    %62 = vector.broadcast %cst_21 : f32 to vector<16x64xf32>
    %63 = arith.maximumf %61, %62 : vector<16x64xf32>
    %cst_22 = arith.constant dense<0.000000e+00> : vector<16x32xf32>
    %64 = tpu.matmul %63, %7, %cst_22 {dimension_numbers = #tpu.dot_dimension_numbers<[1], [0], [0], [1], [0, 0, 1, 1], [], []>} : vector<16x64xf32>, vector<64x32xf32>, vector<16x32xf32> -> vector<16x32xf32>
    %65 = arith.addf %48, %64 : vector<16x32xf32>
    %c0_23 = arith.constant 0 : index
    %c0_24 = arith.constant 0 : index
    %66 = vector.load %arg2[%c0_23, %c0_24] : memref<16x32xf32, #tpu.memory_space<vmem>>, vector<16x32xf32>
    tpu.vector_store %arg2[%c0_23, %c0_24], %65 {strides = array<i32>} : memref<16x32xf32, #tpu.memory_space<vmem>>, vector<16x32xf32>,
    return
  }
}

</mosaic_0001>

<bundles_post_ra>
// kernel: tpu_custom_call.1
= control target key start
LH: loop header
LB: loop body
LE: loop exit
PB: predicated region body
PF: predicated region fallthrough
CT: control target
= control target key end

     0   :  { %7 = vsyncpa [#allocation3], 0  ;;  %s1564_s0 = inlined_call_operand.hbm [shape: f32[16,32], index: 0, kind: input, shape index: {}]   ;;  %s1565_s1 = inlined_call_operand.hbm [shape: f32[240,128], index: 1, kind: input, shape index: {}]   ;;  %s1566_s2 = inlined_call_operand.hbm [shape: f32[16,32], index: 2, kind: output, shape index: {}]  }
   0x1   :  { %8 = vsyncpa [#allocation6], 0 }
   0x2   :  { %9 = vsyncpa [#allocation4], 0  ;;  %s1356_s9 = smov [#allocation2]   ;;  %s1284_s13 = scalar_lea.hbm %s1564_s0, 256 }
   0x3   :  { %s15_s10 = sshll.u32 %s1356_s9, 4  ;;  %p1285_p0 = scmp.ne.s32.totalorder %s1564_s0, %s1284_s13  ;;  %s16_s10 = int_to_ptr.vmem [resolvable:$true] %s15_s10 }
   0x4   :  { %p1288_p1 = scmp.lt.u32.totalorder %s1284_s13, %s1564_s0 }
   0x6   :  { %p1290_p2 = pnand %p1288_p1, %p1285_p0 }
   0x8   :  { %1293 = shalt.err (!%p1290_p2)
}
   0x9   :  { %s1294_s18 = scalar_lea.vmem %s16_s10, 256  ;;  %p1299_p4 = scmp.lt.s32.totalorder %s16_s10, %s16_s10 }
   0xa   :  { %p1295_p3 = scmp.ne.s32.totalorder %s16_s10, %s1294_s18  ;;  %p1300_p5 = scmp.lt.s32.totalorder %s1294_s18, %s1294_s18 }
   0xc   :  { %p1301_p6 = por %p1300_p5, %p1299_p4 }
   0xe   :  { %p1302_p7 = pnand %p1301_p6, %p1295_p3 }
  0x10   :  { %1305 = shalt.err (!%p1302_p7)
}
  0x11   :  { %s1357_s19 = smov 128   ;;  %s1358_s20 = smov 8  }
  0x12   :  { %21 = dma.hbm_to_vmem [thread:$0]  %s1564_s0, 256, %s16_s10, [#allocation3], %s1357_s19, %s1357_s19, %s1358_s20  }
  0x13   :  { %s1359_s23 = smov [#allocation5]   ;;  %s1306_s27 = scalar_lea.hbm %s1565_s1, 3840 }
  0x14   :  { %s27_s24 = sshll.u32 %s1359_s23, 4  ;;  %p1307_p8 = scmp.ne.s32.totalorder %s1565_s1, %s1306_s27  ;;  %s28_s24 = int_to_ptr.vmem [resolvable:$true] %s27_s24 }
  0x15   :  { %p1310_p9 = scmp.lt.u32.totalorder %s1306_s27, %s1565_s1 }
  0x17   :  { %p1312_p10 = pnand %p1310_p9, %p1307_p8 }
  0x19   :  { %1315 = shalt.err (!%p1312_p10)
}
  0x1a   :  { %s1316_s4 = scalar_lea.vmem %s28_s24, 3840  ;;  %p1321_p12 = scmp.lt.s32.totalorder %s28_s24, %s28_s24 }
  0x1b   :  { %p1317_p11 = scmp.ne.s32.totalorder %s28_s24, %s1316_s4  ;;  %p1322_p13 = scmp.lt.s32.totalorder %s1316_s4, %s1316_s4 }
  0x1d   :  { %p1323_p0 = por %p1322_p13, %p1321_p12 }
  0x1f   :  { %p1324_p1 = pnand %p1323_p0, %p1317_p11 }
  0x21   :  { %1327 = shalt.err (!%p1324_p1)
}
  0x22   :  { %33 = dma.hbm_to_vmem [thread:$0]  %s1565_s1, 3840, %s28_s24, [#allocation6], %s1357_s19, %s1357_s19, %s1358_s20  }
  0x23   :  { %1350 = dma.done.wait [#allocation3], 256  }
  0x24   :  { %1351 = vsyncadd [#allocation3], 4294967040 }
  0x25   :  { %1352 = dma.done.wait [#allocation6], 3840  }
  0x26   :  { %1353 = vsyncadd [#allocation6], 4294963456  ;;  %v1413_v0 = vld [vmem:[#allocation2] sm:$0xff]  ;;  %vm74_vm0 = vcmask 261120   ;;  %v1415_v1 = vld [vmem:[#allocation2 + $0x8] sm:$0xff]  ;;  %vm207_vm1 = vcmask 64512  }
  0x27   :  { %v72_v2 = vmul.f32 %v1413_v0, %v1413_v0  ;;  %v73_v3 = vmul.f32 %v1415_v1, %v1415_v1  ;;  %v43_v6 = vld [vmem:[#allocation5 + $0x8] sm:$0xff]  ;;  %v44_v7 = vld [vmem:[#allocation5 + $0x10] sm:$0xff]  ;;  %v45_v8 = vld [vmem:[#allocation5 + $0x18] sm:$0xff]  ;;  %s1360_s1 = smov 80   ;;  %s1361_s6 = smov 104   ;;  %vm345_vm3 = vcmask 523264  }
  0x28   :  { %v1112_v9 = vpack.c.bf16 %v44_v7, %v43_v6  ;;  %v46_v10 = vld [vmem:[#allocation5 + $0x20] sm:$0xff]  ;;  %s1362_s7 = smov 56   ;;  %s1363_s8 = smov 120   ;;  %vm1442_vm2 = vmpackc.low %vm207_vm1, %vm207_vm1  ;;  %v52_v54 = vld [vmem:[#allocation5 + $0x50] sm:$0xff]  ;;  %vm613_vm4 = vcmask 130048   ;;  %vm616_vm5 = vcmask 195584  }
  0x29   :  { %v75_v4 = vsel %vm74_vm0, %v72_v2, 0.0  ;;  %v78_v5 = vsel %vm74_vm0, %v73_v3, 0.0  ;;  %v1116_v11 = vpack.c.bf16 %v46_v10, %v45_v8  ;;  %v910_v19 = vld [vmem:[#allocation5] ss:$0 sm:$0xff]  ;;  %v51_v55 = vld [vmem:[#allocation5 + $0x48] sm:$0xff]  ;;  %v53_v62 = vld [vmem:[#allocation5 + $0x58] sm:$0xff] }
  0x2a   :  { %76 = vadd.xlane.f32.xlu0 %v75_v4  ;;  %1113 = vmatprep.subr.bf16.mxu0 %v1112_v9  ;;  %v54_v60 = vld [vmem:[#allocation5 + $0x60] sm:$0xff]  ;;  %v56_v6 = vld [vmem:[#allocation5 + $0x70] sm:$0xff]  ;;  %v55_v7 = vld [vmem:[#allocation5 + $0x68] sm:$0xff]  ;;  %s1364_s9 = smov 112   ;;  %s1365_s10 = smov 16  }
  0x2b   :  { %1115 = vmatpush3.bf16.msra.mxu0 %v1112_v9  ;;  %s1366_s11 = smov 24   ;;  %s1367_s12 = smov [#allocation7]  }
  0x2c   :  { %1117 = vmatprep.subr.bf16.mxu0 %v1116_v11  ;;  %s897_s13 = sshll.u32 %s1367_s12, 4  ;;  %s898_s13 = int_to_ptr.vmem [resolvable:$true] %s897_s13 }
  0x2d   :  { %s1328_s14 = scalar_lea.vmem %s898_s13, 256  ;;  %p1333_p3 = scmp.lt.s32.totalorder %s898_s13, %s898_s13 }
  0x2e   :  { %79 = vadd.xlane.f32.xlu0 %v78_v5  ;;  %p1329_p2 = scmp.ne.s32.totalorder %s898_s13, %s1328_s14  ;;  %p1334_p4 = scmp.lt.s32.totalorder %s1328_s14, %s1328_s14 }
  0x2f   :  { %1119 = vmatpush3.bf16.msra.mxu0 %v1116_v11 }
  0x30   :  { %p1335_p5 = por %p1334_p4, %p1333_p3 }
  0x32   :  { %p1336_p6 = pnand %p1335_p5, %p1329_p2 }
  0xb7   :  { %v77_v12 = vpop.xlane.xlu0 %76 }
  0xb8   :  { %v82_v13 = vmul.f32 0.03125, %v77_v12 }
  0xba   :  { %v84_v14 = vadd.f32 1e-06, %v82_v13 }
  0xbb   :  { %v80_v15 = vpop.xlane.xlu0 %79 }
  0xbc   :  { %1244 = vrsqrt.f32 %v84_v14  ;;  %v83_v16 = vmul.f32 0.03125, %v80_v15  ;;  %v58_v14 = vld [vmem:[#allocation5 + $0x80] sm:$0xff]  ;;  %v57_v15 = vld [vmem:[#allocation5 + $0x78] sm:$0xff] }
  0xbe   :  { %v85_v17 = vadd.f32 1e-06, %v83_v16 }
  0xc0   :  { %1246 = vrsqrt.f32 %v85_v17 }
  0xc6   :  { %v1245_v18 = vpop.eup %1244 }
  0xc7   :  { %v88_v20 = vmul.f32 %v1245_v18, %v1413_v0 }
  0xc9   :  { %v94_v21 = vmul.f32 %v910_v19, %v88_v20 }
  0xca   :  { %v1247_v22 = vpop.eup %1246 }
  0xcb   :  { %v89_v23 = vmul.f32 %v1247_v22, %v1415_v1  ;;  %1012 = vmatprep.mubr.msk.f32.mxu0 %vm74_vm0, %v94_v21 }
  0xcd   :  { %v95_v24 = vmul.f32 %v910_v19, %v89_v23 }
  0xcf   :  { %1013 = vmatmul.mubr.msk.f32.vlgmr.msra.gmra.mrb[0].mxu0 %vm74_vm0, %v95_v24 }
 0x1a2   :  { %v1014_v25 = vpop.f32.mrb[0].mxu0 }
 0x1a3   :  { %v168_v26 = vpop.f32.mrb[1].mxu0 }
 0x1a4   :  { %183 = vrot.lane.b32.xlu0 %v168_v26, %s1360_s1  ;;  %179 = vrot.lane.b32.xlu1 %v168_v26, %s1361_s6  ;;  %v1427_v27 = vpack.i.bf16 %v1014_v25, %v168_v26 }
 0x1a5   :  { %1031 = vmatprep.mubr.msk.f32.mxu1 %vm207_vm1, %v168_v26 }
 0x1a8   :  { %181 = vrot.lane.b32.xlu1 %v1014_v25, %s1361_s6 }
 0x1ac   :  { %185 = vrot.lane.b32.xlu1 %v1014_v25, %s1360_s1 }
 0x1b0   :  { %187 = vrot.lane.b32.xlu1 %v168_v26, %s1362_s7 }
 0x1b4   :  { %189 = vrot.lane.b32.xlu1 %v1014_v25, %s1362_s7 }
 0x1b8   :  { %1205 = vrot.lane.b32.xlu1 %v1427_v27, %s1363_s8 }
 0x216   :  { %v180_v28 = vpop.permute.xlu1 %179  ;;  %v184_v31 = vpop.permute.xlu0 %183 }
 0x21a   :  { %v182_v29 = vpop.permute.xlu1 %181 }
 0x21b   :  { %v1431_v30 = vpack.i.bf16 %v182_v29, %v180_v28 }
 0x21d   :  { %1210 = vrot.lane.b32.xlu1 %v1431_v30, %s1363_s8 }
 0x21e   :  { %v186_v32 = vpop.permute.xlu1 %185 }
 0x21f   :  { %v1434_v33 = vpack.i.bf16 %v186_v32, %v184_v31 }
 0x221   :  { %1215 = vrot.lane.b32.xlu1 %v1434_v33, %s1363_s8 }
 0x222   :  { %v188_v34 = vpop.permute.xlu1 %187 }
 0x226   :  { %v190_v35 = vpop.permute.xlu1 %189 }
 0x227   :  { %v1437_v36 = vpack.i.bf16 %v190_v35, %v188_v34 }
 0x229   :  { %1220 = vrot.lane.b32.xlu0 %v1437_v36, %s1363_s8 }
 0x22a   :  { %v1206_v37 = vpop.permute.xlu1 %1205 }
 0x22b   :  { %v1208_v38 = vunpack.i.h.bf16 %v1206_v37  ;;  %v1207_v39 = vunpack.i.l.bf16 %v1206_v37 }
 0x22d   :  { %v1120_v41 = vpack.c.bf16 %v1208_v38, %v1207_v39 }
 0x22f   :  { %1122 = vmatprep.subr.msk.bf16.mxu1 %vm1442_vm2, %v1120_v41 }
 0x230   :  { %1125 = vmatpush3.bf16.xpose.msk.msra.mxu1 %vm1442_vm2, %v1120_v41 }
 0x28f   :  { %v1211_v42 = vpop.permute.xlu1 %1210 }
 0x290   :  { %v1213_v43 = vunpack.i.h.bf16 %v1211_v42  ;;  %v1212_v44 = vunpack.i.l.bf16 %v1211_v42 }
 0x292   :  { %v1126_v45 = vpack.c.bf16 %v1213_v43, %v1212_v44 }
 0x293   :  { %v1216_v46 = vpop.permute.xlu1 %1215 }
 0x294   :  { %v1218_v47 = vunpack.i.h.bf16 %v1216_v46  ;;  %v1217_v48 = vunpack.i.l.bf16 %v1216_v46  ;;  %1128 = vmatprep.subr.msk.bf16.mxu1 %vm1442_vm2, %v1126_v45 }
 0x295   :  { %1131 = vmatpush3.bf16.xpose.msk.msra.mxu1 %vm1442_vm2, %v1126_v45 }
 0x296   :  { %v1132_v49 = vpack.c.bf16 %v1218_v47, %v1217_v48 }
 0x298   :  { %1134 = vmatprep.subr.msk.bf16.mxu1 %vm1442_vm2, %v1132_v49 }
 0x29b   :  { %v1221_v50 = vpop.permute.xlu0 %1220 }
 0x29c   :  { %v1223_v51 = vunpack.i.h.bf16 %v1221_v50  ;;  %v1222_v52 = vunpack.i.l.bf16 %v1221_v50 }
 0x29d   :  { %1137 = vmatpush3.bf16.xpose.msk.msra.mxu1 %vm1442_vm2, %v1132_v49 }
 0x29e   :  { %v1138_v53 = vpack.c.bf16 %v1223_v51, %v1222_v52 }
 0x2a0   :  { %1140 = vmatprep.subr.msk.bf16.mxu1 %vm1442_vm2, %v1138_v53 }
 0x2a5   :  { %1143 = vmatpush3.bf16.xpose.msk.msra.mxu1 %vm1442_vm2, %v1138_v53 }
 0x2ac   :  { %1032 = vmatmul.mubr.msk.f32.vlgmr.msra.gmra.mrb[0].mxu1 %vm207_vm1, %v1014_v25 }
 0x2ad   :  { %1034 = vmatprep.mubr.msk.f32.mxu1 %vm207_vm1, %v180_v28 }
 0x2b0   :  { %1035 = vmatmul.mubr.msk.f32.gmra.mrb[2].mxu1 %vm207_vm1, %v182_v29 }
 0x2b1   :  { %1037 = vmatprep.mubr.msk.f32.mxu1 %vm207_vm1, %v184_v31 }
 0x2b4   :  { %1038 = vmatmul.mubr.msk.f32.gmra.mrb[4].mxu1 %vm207_vm1, %v186_v32 }
 0x2b5   :  { %1040 = vmatprep.mubr.msk.f32.mxu1 %vm207_vm1, %v188_v34 }
 0x2b8   :  { %1041 = vmatmul.mubr.msk.f32.gmra.mrb[6].mxu1 %vm207_vm1, %v190_v35 }
 0x37f   :  { %v1033_v56 = vpop.f32.mrb[0].mxu1 }
 0x380   :  { %v312_v57 = vadd.f32 %v1033_v56, %v52_v54  ;;  %v306_v58 = vpop.f32.mrb[1].mxu1 }
 0x381   :  { %v307_v59 = vadd.f32 %v306_v58, %v51_v55 }
 0x382   :  { %v349_v61 = vsel %vm345_vm3, %v312_v57, -inf }
 0x383   :  { %350 = vmax.xlane.f32.xlu0 %v349_v61  ;;  %v1036_v63 = vpop.f32.mrb[2].mxu1  ;;  %v346_v2 = vsel %vm345_vm3, %v307_v59, -inf }
 0x384   :  { %v322_v3 = vadd.f32 %v1036_v63, %v54_v60  ;;  %v316_v4 = vpop.f32.mrb[3].mxu1  ;;  %347 = vmax.xlane.f32.xlu1 %v346_v2 }
 0x385   :  { %v317_v5 = vadd.f32 %v316_v4, %v53_v62 }
 0x386   :  { %v355_v8 = vsel %vm345_vm3, %v322_v3, -inf }
 0x387   :  { %v1039_v9 = vpop.f32.mrb[4].mxu1  ;;  %v352_v10 = vsel %vm345_vm3, %v317_v5, -inf }
 0x388   :  { %v332_v11 = vadd.f32 %v1039_v9, %v56_v6  ;;  %v326_v12 = vpop.f32.mrb[5].mxu1  ;;  %353 = vmax.xlane.f32.xlu0 %v352_v10  ;;  %356 = vmax.xlane.f32.xlu1 %v355_v8 }
 0x389   :  { %v327_v13 = vadd.f32 %v326_v12, %v55_v7 }
 0x38a   :  { %v361_v16 = vsel %vm345_vm3, %v332_v11, -inf }
 0x38b   :  { %v1042_v17 = vpop.f32.mrb[6].mxu1  ;;  %v358_v18 = vsel %vm345_vm3, %v327_v13, -inf }
 0x38c   :  { %v342_v19 = vadd.f32 %v1042_v17, %v58_v14  ;;  %v336_v20 = vpop.f32.mrb[7].mxu1  ;;  %359 = vmax.xlane.f32.xlu0 %v358_v18  ;;  %362 = vmax.xlane.f32.xlu1 %v361_v16 }
 0x38d   :  { %v337_v21 = vadd.f32 %v336_v20, %v57_v15 }
 0x38e   :  { %v367_v22 = vsel %vm345_vm3, %v342_v19, -inf }
 0x38f   :  { %v364_v23 = vsel %vm345_vm3, %v337_v21, -inf }
 0x390   :  { %365 = vmax.xlane.f32.xlu0 %v364_v23  ;;  %368 = vmax.xlane.f32.xlu1 %v367_v22 }
 0x3a6   :  { %1225 = vrot.lane.b32.xlu0 %v1427_v27, %s1364_s9 }
 0x410   :  { %v351_v24 = vpop.xlane.xlu0 %350 }
 0x411   :  { %v371_v25 = vsub.f32 %v312_v57, %v351_v24  ;;  %v348_v26 = vpop.xlane.xlu1 %347 }
 0x412   :  { %v370_v28 = vsub.f32 %v307_v59, %v348_v26 }
 0x413   :  { %v380_v29 = vmul.f32 1.442695, %v371_v25 }
 0x414   :  { %v378_v31 = vmul.f32 1.442695, %v370_v28 }
 0x415   :  { %1248 = vpow2.f32 %v380_v29  ;;  %v354_v32 = vpop.xlane.xlu0 %353  ;;  %v357_v34 = vpop.xlane.xlu1 %356 }
 0x416   :  { %1250 = vpow2.f32 %v378_v31  ;;  %v372_v35 = vsub.f32 %v317_v5, %v354_v32  ;;  %v373_v37 = vsub.f32 %v322_v3, %v357_v34 }
 0x418   :  { %v382_v38 = vmul.f32 1.442695, %v372_v35  ;;  %v384_v39 = vmul.f32 1.442695, %v373_v37 }
 0x419   :  { %v360_v40 = vpop.xlane.xlu0 %359  ;;  %v363_v41 = vpop.xlane.xlu1 %362 }
 0x41a   :  { %1252 = vpow2.f32 %v382_v38  ;;  %v374_v42 = vsub.f32 %v327_v13, %v360_v40  ;;  %v375_v43 = vsub.f32 %v332_v11, %v363_v41 }
 0x41b   :  { %1254 = vpow2.f32 %v384_v39 }
 0x41c   :  { %v386_v27 = vmul.f32 1.442695, %v374_v42  ;;  %v388_v44 = vmul.f32 1.442695, %v375_v43 }
 0x41d   :  { %v366_v45 = vpop.xlane.xlu0 %365  ;;  %v369_v46 = vpop.xlane.xlu1 %368 }
 0x41e   :  { %1256 = vpow2.f32 %v386_v27  ;;  %v376_v47 = vsub.f32 %v337_v21, %v366_v45  ;;  %v377_v48 = vsub.f32 %v342_v19, %v369_v46  ;;  %v47_v45 = vld [vmem:[#allocation5 + $0x28] sm:$0xff]  ;;  %v48_v46 = vld [vmem:[#allocation5 + $0x30] sm:$0xff] }
 0x41f   :  { %v1479_v49 = vpop.eup %1248  ;;  %1258 = vpow2.f32 %v388_v44 }
 0x420   :  { %v1251_v50 = vpop.eup %1250  ;;  %v392_v51 = vmul.f32 1.442695, %v377_v48  ;;  %v397_v52 = vsel %vm345_vm3, %v1479_v49, 0.0  ;;  %v390_v53 = vmul.f32 1.442695, %v376_v47  ;;  %v1160_v47 = vpack.c.bf16 %v48_v46, %v47_v45  ;;  %v49_v48 = vld [vmem:[#allocation5 + $0x38] sm:$0xff] }
 0x421   :  { %v1226_v54 = vpop.permute.xlu0 %1225  ;;  %398 = vadd.xlane.f32.xlu1 %v397_v52  ;;  %v394_v55 = vsel %vm345_vm3, %v1251_v50, 0.0 }
 0x422   :  { %v1228_v56 = vunpack.i.h.bf16 %v1226_v54  ;;  %v1227_v57 = vunpack.i.l.bf16 %v1226_v54  ;;  %395 = vadd.xlane.f32.xlu0 %v394_v55  ;;  %1260 = vpow2.f32 %v392_v51 }
 0x423   :  { %1262 = vpow2.f32 %v390_v53 }
 0x424   :  { %v1484_v58 = vpop.eup %1252  ;;  %v1144_v59 = vpack.c.bf16 %v1228_v56, %v1227_v57 }
 0x425   :  { %v1486_v60 = vpop.eup %1254  ;;  %v400_v61 = vsel %vm345_vm3, %v1484_v58, 0.0 }
 0x426   :  { %1145 = vmatprep.subr.bf16.mxu0 %v1144_v59  ;;  %401 = vadd.xlane.f32.xlu0 %v400_v61  ;;  %v403_v62 = vsel %vm345_vm3, %v1486_v60, 0.0 }
 0x427   :  { %404 = vadd.xlane.f32.xlu1 %v403_v62  ;;  %1147 = vmatpush3.bf16.msra.mxu0 %v1144_v59 }
 0x428   :  { %v1257_v63 = vpop.eup %1256 }
 0x429   :  { %v1492_v2 = vpop.eup %1258  ;;  %v406_v3 = vsel %vm345_vm3, %v1257_v63, 0.0 }
 0x42a   :  { %407 = vadd.xlane.f32.xlu0 %v406_v3  ;;  %v409_v4 = vsel %vm345_vm3, %v1492_v2, 0.0 }
 0x42b   :  { %410 = vadd.xlane.f32.xlu1 %v409_v4 }
 0x42c   :  { %v1497_v5 = vpop.eup %1260 }
 0x42d   :  { %v415_v6 = vsel %vm345_vm3, %v1497_v5, 0.0  ;;  %v1263_v7 = vpop.eup %1262 }
 0x42e   :  { %v412_v8 = vsel %vm345_vm3, %v1263_v7, 0.0 }
 0x42f   :  { %416 = vadd.xlane.f32.xlu1 %v415_v6 }
 0x433   :  { %413 = vadd.xlane.f32.xlu1 %v412_v8 }
 0x440   :  { %1235 = vrot.lane.b32.xlu0 %v1434_v33, %s1364_s9 }
 0x444   :  { %1230 = vrot.lane.b32.xlu1 %v1431_v30, %s1364_s9  ;;  %1240 = vrot.lane.b32.xlu0 %v1437_v36, %s1364_s9 }
 0x4ae   :  { %v399_v9 = vpop.xlane.xlu1 %398 }
 0x4af   :  { %v396_v10 = vpop.xlane.xlu0 %395 }
 0x4b0   :  { %1264 = vrcp.f32 %v396_v10 }
 0x4b1   :  { %1266 = vrcp.f32 %v399_v9 }
 0x4b3   :  { %v402_v11 = vpop.xlane.xlu0 %401 }
 0x4b4   :  { %v405_v12 = vpop.xlane.xlu1 %404  ;;  %1268 = vrcp.f32 %v402_v11 }
 0x4b5   :  { %1270 = vrcp.f32 %v405_v12 }
 0x4b7   :  { %v408_v15 = vpop.xlane.xlu0 %407 }
 0x4b8   :  { %v411_v13 = vpop.xlane.xlu1 %410  ;;  %1272 = vrcp.f32 %v408_v15 }
 0x4b9   :  { %1274 = vrcp.f32 %v411_v13 }
 0x4ba   :  { %v1265_v14 = vpop.eup %1264 }
 0x4bb   :  { %v426_v16 = vmul.f32 %v1265_v14, %v1251_v50  ;;  %v1236_v18 = vpop.permute.xlu0 %1235  ;;  %v1267_v29 = vpop.eup %1266 }
 0x4bc   :  { %v417_v17 = vpop.xlane.xlu1 %416  ;;  %v1238_v20 = vunpack.i.h.bf16 %v1236_v18  ;;  %v1237_v30 = vunpack.i.l.bf16 %v1236_v18  ;;  %v427_v32 = vmul.f32 %v1267_v29, %v1479_v49  ;;  %v50_v49 = vld [vmem:[#allocation5 + $0x40] sm:$0xff]  ;;  %v61_v18 = vld [vmem:[#allocation5 + $0x98] sm:$0xff] }
 0x4bd   :  { %1059 = vmatprep.mubr.msk.f32.mxu0 %vm345_vm3, %v426_v16  ;;  %v1164_v50 = vpack.c.bf16 %v50_v49, %v49_v48 }
 0x4be   :  { %v1152_v24 = vpack.c.bf16 %v1238_v20, %v1237_v30  ;;  %v1269_v31 = vpop.eup %1268  ;;  %v65_v30 = vld [vmem:[#allocation5 + $0xb8] sm:$0xff] }
 0x4bf   :  { %v1241_v36 = vpop.permute.xlu0 %1240  ;;  %v1271_v34 = vpop.eup %1270  ;;  %v428_v35 = vmul.f32 %v1269_v31, %v1484_v58 }
 0x4c0   :  { %v414_v33 = vpop.xlane.xlu1 %413  ;;  %v1243_v25 = vunpack.i.h.bf16 %v1241_v36  ;;  %v1242_v26 = vunpack.i.l.bf16 %v1241_v36  ;;  %v429_v38 = vmul.f32 %v1271_v34, %v1486_v60  ;;  %v67_v36 = vld [vmem:[#allocation5 + $0xc8] sm:$0xff] }
 0x4c1   :  { %1276 = vrcp.f32 %v414_v33 }
 0x4c2   :  { %v1156_v28 = vpack.c.bf16 %v1243_v25, %v1242_v26  ;;  %1278 = vrcp.f32 %v417_v17  ;;  %v1273_v37 = vpop.eup %1272  ;;  %v60_v17 = vld [vmem:[#allocation5 + $0x90] sm:$0xff]  ;;  %v69_v25 = vld [vmem:[#allocation5 + $0xd8] sm:$0xff] }
 0x4c3   :  { %v1275_v39 = vpop.eup %1274  ;;  %v430_v40 = vmul.f32 %v1273_v37, %v1257_v63  ;;  %v1168_v33 = vpack.c.bf16 %v61_v18, %v60_v17 }
 0x4c4   :  { %v1231_v19 = vpop.permute.xlu1 %1230  ;;  %v431_v42 = vmul.f32 %v1275_v39, %v1492_v2  ;;  %v939_v39 = vld [vmem:[#allocation5 + $0x88] ss:$0 sm:$0xff] }
 0x4c5   :  { %v1233_v21 = vunpack.i.h.bf16 %v1231_v19  ;;  %v1232_v22 = vunpack.i.l.bf16 %v1231_v19  ;;  %v63_v19 = vld [vmem:[#allocation5 + $0xa8] sm:$0xff] }
 0x4c7   :  { %v1148_v23 = vpack.c.bf16 %v1233_v21, %v1232_v22  ;;  %v66_v21 = vld [vmem:[#allocation5 + $0xc0] sm:$0xff] }
 0x4c9   :  { %1149 = vmatprep.subr.bf16.mxu0 %v1148_v23 }
 0x4ca   :  { %1151 = vmatpush3.bf16.msra.mxu0 %v1148_v23  ;;  %v1180_v23 = vpack.c.bf16 %v67_v36, %v66_v21 }
 0x4cb   :  { %1153 = vmatprep.subr.bf16.mxu0 %v1152_v24  ;;  %v1277_v41 = vpop.eup %1276 }
 0x4cc   :  { %v1279_v43 = vpop.eup %1278  ;;  %v432_v27 = vmul.f32 %v1277_v41, %v1263_v7 }
 0x4cd   :  { %v433_v44 = vmul.f32 %v1279_v43, %v1497_v5 }
 0x4ce   :  { %1155 = vmatpush3.bf16.msra.mxu0 %v1152_v24  ;;  %v68_v24 = vld [vmem:[#allocation5 + $0xd0] sm:$0xff] }
 0x4cf   :  { %1157 = vmatprep.subr.bf16.mxu0 %v1156_v28  ;;  %v1184_v26 = vpack.c.bf16 %v69_v25, %v68_v24 }
 0x4d2   :  { %1159 = vmatpush3.bf16.msra.mxu0 %v1156_v28 }
 0x4d3   :  { %1161 = vmatprep.subr.bf16.mxu0 %v1160_v47 }
 0x4d5   :  { %1060 = vmatmul.mubr.msk.f32.vlgmr.msra.gmra.mrb[2].mxu0 %vm345_vm3, %v427_v32 }
 0x4d6   :  { %1062 = vmatprep.mubr.msk.f32.mxu0 %vm345_vm3, %v428_v35  ;;  %1163 = vmatpush3.bf16.msra.mxu0 %v1160_v47 }
 0x4d7   :  { %1165 = vmatprep.subr.bf16.mxu0 %v1164_v50 }
 0x4d9   :  { %1063 = vmatmul.mubr.msk.f32.gmra.mrb[4].mxu0 %vm345_vm3, %v429_v38 }
 0x4da   :  { %1065 = vmatprep.mubr.msk.f32.mxu0 %vm345_vm3, %v430_v40  ;;  %1167 = vmatpush3.bf16.msra.mxu0 %v1164_v50 }
 0x4db   :  { %1169 = vmatprep.subr.bf16.mxu0 %v1168_v33 }
 0x4dd   :  { %1066 = vmatmul.mubr.msk.f32.gmra.mrb[6].mxu0 %vm345_vm3, %v431_v42 }
 0x4de   :  { %1068 = vmatprep.mubr.msk.f32.mxu0 %vm345_vm3, %v432_v27  ;;  %v70_v27 = vld [vmem:[#allocation5 + $0xe0] sm:$0xff] }
 0x4e1   :  { %1069 = vmatmul.mubr.msk.f32.gmra.mrb[8].mxu0 %vm345_vm3, %v433_v44  ;;  %v71_v44 = vld [vmem:[#allocation5 + $0xe8] sm:$0xff] }
 0x4e2   :  { %v1188_v45 = vpack.c.bf16 %v71_v44, %v70_v27 }
 0x5a8   :  { %v1061_v51 = vpop.f32.mrb[2].mxu0 }
 0x5a9   :  { %v548_v52 = vpop.f32.mrb[3].mxu0 }
 0x5ac   :  { %v1064_v53 = vpop.f32.mrb[4].mxu0 }
 0x5ad   :  { %591 = vrot.lane.b32.xlu0 %v1064_v53, %s1358_s20  ;;  %v558_v54 = vpop.f32.mrb[5].mxu0 }
 0x5ae   :  { %589 = vrot.lane.b32.xlu1 %v558_v54, %s1358_s20 }
 0x5b0   :  { %v1067_v55 = vpop.f32.mrb[6].mxu0 }
 0x5b1   :  { %599 = vrot.lane.b32.xlu0 %v1067_v55, %s1365_s10  ;;  %v568_v56 = vpop.f32.mrb[7].mxu0 }
 0x5b2   :  { %597 = vrot.lane.b32.xlu1 %v568_v56, %s1365_s10 }
 0x5b4   :  { %v1070_v57 = vpop.f32.mrb[8].mxu0 }
 0x5b5   :  { %607 = vrot.lane.b32.xlu0 %v1070_v57, %s1366_s11  ;;  %v578_v58 = vpop.f32.mrb[9].mxu0 }
 0x5b6   :  { %605 = vrot.lane.b32.xlu1 %v578_v58, %s1366_s11 }
 0x61f   :  { %v592_v59 = vpop.permute.xlu0 %591 }
 0x620   :  { %v590_v60 = vpop.permute.xlu1 %589  ;;  %v612_v3 = vsel %vm207_vm1, %v1061_v51, %v592_v59 }
 0x621   :  { %v611_v63 = vsel %vm207_vm1, %v548_v52, %v590_v60 }
 0x623   :  { %v600_v61 = vpop.permute.xlu0 %599 }
 0x624   :  { %v598_v62 = vpop.permute.xlu1 %597  ;;  %v615_v6 = vsel %vm613_vm4, %v612_v3, %v600_v61 }
 0x625   :  { %v614_v4 = vsel %vm613_vm4, %v611_v63, %v598_v62 }
 0x627   :  { %v608_v2 = vpop.permute.xlu0 %607 }
 0x628   :  { %v606_v5 = vpop.permute.xlu1 %605  ;;  %v618_v8 = vsel %vm616_vm5, %v615_v6, %v608_v2 }
 0x629   :  { %v617_v7 = vsel %vm616_vm5, %v614_v4, %v606_v5 }
 0x62a   :  { %1079 = vmatprep.mubr.msk.f32.mxu0 %vm74_vm0, %v617_v7 }
 0x62b   :  { %1080 = vmatmul.mubr.msk.f32.vlgmr.msra.gmra.mrb[10].mxu0 %vm74_vm0, %v618_v8 }
 0x62c   :  { %1171 = vmatpush3.bf16.msra.mxu0 %v1168_v33 }
 0x6fe   :  { %v1081_v9 = vpop.f32.mrb[10].mxu0 }
 0x6ff   :  { %v1528_v10 = vadd.f32 %v1081_v9, %v1415_v1  ;;  %v691_v11 = vpop.f32.mrb[11].mxu0  ;;  %v62_v1 = vld [vmem:[#allocation5 + $0xa0] sm:$0xff] }
 0x700   :  { %v1531_v12 = vadd.f32 %v691_v11, %v1413_v0  ;;  %v1172_v20 = vpack.c.bf16 %v63_v19, %v62_v1  ;;  %v64_v0 = vld [vmem:[#allocation5 + $0xb0] sm:$0xff] }
 0x701   :  { %v703_v13 = vmul.f32 %v1528_v10, %v1528_v10  ;;  %v1176_v22 = vpack.c.bf16 %v65_v30, %v64_v0 }
 0x702   :  { %v702_v14 = vmul.f32 %v1531_v12, %v1531_v12  ;;  %1173 = vmatprep.subr.bf16.mxu0 %v1172_v20 }
 0x703   :  { %v707_v15 = vsel %vm74_vm0, %v703_v13, 0.0  ;;  %1175 = vmatpush3.bf16.msra.mxu0 %v1172_v20  ;;  %1177 = vmatprep.subr.bf16.mxu1 %v1176_v22 }
 0x704   :  { %708 = vadd.xlane.f32.xlu0 %v707_v15  ;;  %v704_v16 = vsel %vm74_vm0, %v702_v14, 0.0  ;;  %1179 = vmatpush3.bf16.msra.mxu1 %v1176_v22 }
 0x705   :  { %705 = vadd.xlane.f32.xlu1 %v704_v16  ;;  %1181 = vmatprep.subr.bf16.mxu1 %v1180_v23 }
 0x708   :  { %1183 = vmatpush3.bf16.msra.mxu1 %v1180_v23 }
 0x709   :  { %1185 = vmatprep.subr.bf16.mxu1 %v1184_v26 }
 0x70c   :  { %1187 = vmatpush3.bf16.msra.mxu1 %v1184_v26 }
 0x70d   :  { %1189 = vmatprep.subr.bf16.mxu1 %v1188_v45 }
 0x710   :  { %1191 = vmatpush3.bf16.msra.mxu1 %v1188_v45 }
 0x791   :  { %v709_v28 = vpop.xlane.xlu0 %708 }
 0x792   :  { %v711_v29 = vmul.f32 0.03125, %v709_v28  ;;  %v706_v31 = vpop.xlane.xlu1 %705 }
 0x793   :  { %v710_v32 = vmul.f32 0.03125, %v706_v31 }
 0x794   :  { %v713_v34 = vadd.f32 1e-06, %v711_v29 }
 0x795   :  { %v712_v35 = vadd.f32 1e-06, %v710_v32 }
 0x796   :  { %1280 = vrsqrt.f32 %v713_v34 }
 0x797   :  { %1282 = vrsqrt.f32 %v712_v35 }
 0x7a0   :  { %v1281_v37 = vpop.eup %1280 }
 0x7a1   :  { %v1283_v38 = vpop.eup %1282  ;;  %v717_v40 = vmul.f32 %v1281_v37, %v1528_v10 }
 0x7a2   :  { %v716_v41 = vmul.f32 %v1283_v38, %v1531_v12 }
 0x7a3   :  { %v723_v43 = vmul.f32 %v939_v39, %v717_v40 }
 0x7a4   :  { %v722_v42 = vmul.f32 %v939_v39, %v716_v41 }
 0x7a6   :  { %1090 = vmatprep.mubr.msk.f32.mxu0 %vm74_vm0, %v722_v42 }
 0x7a7   :  { %1091 = vmatmul.mubr.msk.f32.vlgmr.msra.gmra.mrb[12].mxu0 %vm74_vm0, %v723_v43 }
 0x87a   :  { %v1092_v46 = vpop.f32.mrb[12].mxu0 }
 0x87b   :  { %v796_v47 = vpop.f32.mrb[13].mxu0  ;;  %v806_v49 = vmax.f32 %v1092_v46, 0.0 }
 0x87c   :  { %v805_v48 = vmax.f32 %v796_v47, 0.0 }
 0x87e   :  { %1109 = vmatprep.mubr.msk.f32.mxu1 %vm345_vm3, %v805_v48 }
 0x87f   :  { %1110 = vmatmul.mubr.msk.f32.vlgmr.msra.gmra.mrb[8].mxu1 %vm345_vm3, %v806_v49 }
 0x952   :  { %v1111_v50 = vpop.f32.mrb[8].mxu1 }
 0x953   :  { %v889_v51 = vadd.f32 %v1111_v50, %v1528_v10  ;;  %v879_v52 = vpop.f32.mrb[9].mxu1 }
 0x954   :  { %v888_v53 = vadd.f32 %v879_v52, %v1531_v12 }
 0x955   :  { %891 = vst.msk [vmem:[#allocation7 + $0x8] sm:$0xff] %vm74_vm0, %v889_v51 }
 0x956   :  { %890 = vst.msk [vmem:[#allocation7] sm:$0xff] %vm74_vm0, %v888_v53 }
 0x957   :  { %1339 = shalt.err (!%p1336_p6)
}
 0x958   :  { %s1340_s17 = scalar_lea.hbm %s1566_s2, 256 }
 0x959   :  { %p1341_p7 = scmp.ne.s32.totalorder %s1566_s2, %s1340_s17  ;;  %p1344_p8 = scmp.lt.u32.totalorder %s1340_s17, %s1566_s2 }
 0x95b   :  { %p1346_p9 = pnand %p1344_p8, %p1341_p7 }
 0x95d   :  { %1349 = shalt.err (!%p1346_p9)
}
 0x95e   :  { %903 = dma.vmem_to_hbm [thread:$0]  %s898_s13, 256, %s1566_s2, [#allocation4], %s1357_s19, %s1357_s19, %s1358_s20  }
 0x95f   :  { %1354 = dma.done.wait [#allocation4], 256  }
 0x960   :  { %1355 = vsyncadd [#allocation4], 4294967040 }
 0x961   :  { %907 = vsyncpa [#allocation3], 1 }
 0x962   :  { %908 = vsyncpa [#allocation6], 1 }
 0x963   :  { %909 = vsyncpa [#allocation4], 1 }

</bundles_post_ra>
